<compile_context>
chip_gen: v7x
topology: tpu7x:2x2x1
jax: 0.10.0
libtpu: 0.0.40
codegen_flags: <defaults>
</compile_context>

<pallas_src>
import jax
import jax.numpy as jnp
from jax.experimental import pallas as pl
from jax.experimental.pallas import tpu as pltpu

MAX_TILE_B = 8192  # rows handled by a single un-gridded block / max rows per grid tile

HIDDEN_DIMS = (128, 64, 32)


def _round_up(x, m):
    return ((x + m - 1) // m) * m


def _supports_bf16_elementwise():
    """bf16 VPU/VALU exists on v6e/v7x; keep the epilogue in f32 elsewhere (v5e)."""
    try:
        kind = jax.devices()[0].device_kind.lower()
    except Exception:
        return False
    return ("v6" in kind) or ("v7" in kind)


def mlp_kernel(x_ref, w1_ref, b1_ref, w2_ref, b2_ref,
               w3_ref, b3_ref, w4_ref, b4_ref, out_ref):
    # Weights decide the MXU operand dtype (bf16 fast path, f32 otherwise).
    w1 = w1_ref[...]
    mxu_dtype = w1.dtype
    # Biases of fc1-fc3 decide the epilogue (bias+ReLU) dtype: bf16 on v6e/v7x,
    # f32 on v5e / in the f32 path.  b4/final store stay f32.
    epi_dtype = b1_ref.dtype

    x = x_ref[...].astype(mxu_dtype)  # in-kernel cast (free VPU slots)

    # fc1 + relu   (dropout is identity in eval mode)
    h = jnp.dot(x, w1, preferred_element_type=jnp.float32)
    h = jnp.maximum(h.astype(epi_dtype) + b1_ref[...], 0.0)

    # fc2 + relu
    h = jnp.dot(h.astype(mxu_dtype), w2_ref[...], preferred_element_type=jnp.float32)
    h = jnp.maximum(h.astype(epi_dtype) + b2_ref[...], 0.0)

    # fc3 + relu
    h = jnp.dot(h.astype(mxu_dtype), w3_ref[...], preferred_element_type=jnp.float32)
    h = jnp.maximum(h.astype(epi_dtype) + b3_ref[...], 0.0)

    # fc4 (no activation); bias add + store in f32
    out = jnp.dot(h.astype(mxu_dtype), w4_ref[...], preferred_element_type=jnp.float32)
    out = out + b4_ref[...].astype(jnp.float32)
    out_ref[...] = out.astype(out_ref.dtype)


def prepare_params(params, *, use_bf16=True, bf16_epilogue=None):
    """One-time dtype conversion of weights/biases (hoisted out of the forward call).

    Returns a flat tuple (w1, b1, w2, b2, w3, b3, w4, b4).
    """
    if bf16_epilogue is None:
        bf16_epilogue = use_bf16 and _supports_bf16_elementwise()
    mxu_dtype = jnp.bfloat16 if use_bf16 else jnp.float32
    epi_dtype = jnp.bfloat16 if (use_bf16 and bf16_epilogue) else jnp.float32

    prepared = []
    for i in (1, 2, 3, 4):
        w = params[f"w{i}"].astype(mxu_dtype)
        b_dtype = jnp.float32 if i == 4 else epi_dtype  # final-layer bias stays f32
        b = params[f"b{i}"].astype(b_dtype)
        prepared += [w, b]
    return tuple(prepared)


def improved_model_forward(x, prepared_params, *, max_tile_b=MAX_TILE_B):
    """x: (B, 4) float32 (left in f32 -- the kernel casts internally).

    prepared_params: flat tuple from prepare_params().
    """
    B, in_dim = x.shape
    out_dim = prepared_params[6].shape[1]  # w4: (32, out)

    args = (x,) + tuple(prepared_params)

    flops = 2 * B * (in_dim * HIDDEN_DIMS[0]
                     + HIDDEN_DIMS[0] * HIDDEN_DIMS[1]
                     + HIDDEN_DIMS[1] * HIDDEN_DIMS[2]
                     + HIDDEN_DIMS[2] * out_dim)
    bytes_accessed = int(x.size * x.dtype.itemsize
                         + sum(int(p.size) * p.dtype.itemsize for p in prepared_params)
                         + B * out_dim * 4)
    cost = pl.CostEstimate(flops=flops, transcendentals=0, bytes_accessed=bytes_accessed)

    # ---- Single-block path: whole batch fits comfortably in VMEM.  No grid,
    # no padding, no per-step overhead.
    if B <= max_tile_b:
        vmem = pl.BlockSpec(memory_space=pltpu.MemorySpace.VMEM)
        return pl.pallas_call(
            mlp_kernel,
            out_shape=jax.ShapeDtypeStruct((B, out_dim), jnp.float32),
            in_specs=[vmem] * 9,
            out_specs=vmem,
            cost_estimate=cost,
        )(*args)

    # ---- Tiled path (B > max_tile_b): 1-D batch grid, resident weights,
    # partial last block masked by Pallas (no jnp.pad / slice).
    n_target = pl.cdiv(B, max_tile_b)
    if n_target % 2:
        n_target += 1  # even tile count -> balanced across v7x's 2 TensorCores
    tile_b = _round_up(pl.cdiv(B, n_target), 8)  # multiple of 8 sublanes
    n_tiles = pl.cdiv(B, tile_b)

    const_map = lambda i: (0, 0)  # weights/biases: same block every grid step
    in_specs = [pl.BlockSpec((tile_b, in_dim), lambda i: (i, 0))]
    for k in range(4):
        w = prepared_params[2 * k]
        b = prepared_params[2 * k + 1]
        in_specs.append(pl.BlockSpec(w.shape, const_map))
        in_specs.append(pl.BlockSpec(b.shape, const_map))
    out_specs = pl.BlockSpec((tile_b, out_dim), lambda i: (i, 0))

    return pl.pallas_call(
        mlp_kernel,
        out_shape=jax.ShapeDtypeStruct((B, out_dim), jnp.float32),
        grid_spec=pltpu.PrefetchScalarGridSpec(
            num_scalar_prefetch=0,
            grid=(n_tiles,),
            in_specs=in_specs,
            out_specs=out_specs,
        ),
        compiler_params=pltpu.CompilerParams(
            dimension_semantics=("parallel",)),  # shard batch tiles across TCs
        cost_estimate=cost,
    )(*args)


def init_params(key, input_size=4, output_size=2):
    """Deterministic init mimicking PyTorch Linear (U(-1/sqrt(fan_in), 1/sqrt(fan_in)))."""
    dims = [(input_size, HIDDEN_DIMS[0]),
            (HIDDEN_DIMS[0], HIDDEN_DIMS[1]),
            (HIDDEN_DIMS[1], HIDDEN_DIMS[2]),
            (HIDDEN_DIMS[2], output_size)]
    params = {}
    keys = jax.random.split(key, 2 * len(dims))
    for i, (fan_in, fan_out) in enumerate(dims):
        bound = 1.0 / jnp.sqrt(float(fan_in))
        w = jax.random.uniform(keys[2 * i], (fan_in, fan_out),
                               minval=-bound, maxval=bound, dtype=jnp.float32)
        b = jax.random.uniform(keys[2 * i + 1], (1, fan_out),
                               minval=-bound, maxval=bound, dtype=jnp.float32)
        params[f"w{i+1}"] = w
        params[f"b{i+1}"] = b
    return params


def reference_forward(x, params):
    h = jnp.maximum(x @ params["w1"] + params["b1"], 0.0)
    h = jnp.maximum(h @ params["w2"] + params["b2"], 0.0)
    h = jnp.maximum(h @ params["w3"] + params["b3"], 0.0)
    return h @ params["w4"] + params["b4"]


if __name__ == "__main__":
    key = jax.random.PRNGKey(0)
    k_x, k_p, k_x2, k_x3 = jax.random.split(key, 4)

    INPUT_SIZE, OUTPUT_SIZE = 4, 2
    params = init_params(k_p, INPUT_SIZE, OUTPUT_SIZE)

    # Dtype conversions done ONCE (hoisted out of the forward path).
    params_f32 = prepare_params(params, use_bf16=False)
    params_bf16 = prepare_params(params, use_bf16=True)

    # --- Small batch: single-block path.
    B_small = 8
    x_small = jax.random.normal(k_x, (B_small, INPUT_SIZE), dtype=jnp.float32)
    ref_small = reference_forward(x_small, params)

    out_f32 = jax.block_until_ready(improved_model_forward(x_small, params_f32))
    assert out_f32.shape == (B_small, OUTPUT_SIZE)
    assert jnp.allclose(out_f32, ref_small, atol=1e-4, rtol=1e-4), "f32 small-batch mismatch"

    out_bf16 = jax.block_until_ready(improved_model_forward(x_small, params_bf16))
    assert jnp.allclose(out_bf16, ref_small, atol=1e-1, rtol=1e-1), "bf16 small-batch mismatch"

    # --- Medium batch (<= MAX_TILE_B): still single block, no padding at all.
    B_med = 2056
    x_med = jax.random.normal(k_x2, (B_med, INPUT_SIZE), dtype=jnp.float32)
    ref_med = reference_forward(x_med, params)

    out_med = jax.block_until_ready(improved_model_forward(x_med, params_f32))
    assert out_med.shape == (B_med, OUTPUT_SIZE)
    assert jnp.allclose(out_med, ref_med, atol=1e-4, rtol=1e-4), "f32 medium-batch mismatch"

    # --- Large batch (> MAX_TILE_B, not a multiple of the tile): tiled path with
    # an even tile count and a masked partial last block (no pad / slice ops).
    B_large = 16387
    x_large = jax.random.normal(k_x3, (B_large, INPUT_SIZE), dtype=jnp.float32)
    ref_large = reference_forward(x_large, params)

    out_large_f32 = jax.block_until_ready(improved_model_forward(x_large, params_f32))
    assert out_large_f32.shape == (B_large, OUTPUT_SIZE)
    assert jnp.allclose(out_large_f32, ref_large, atol=1e-4, rtol=1e-4), "f32 tiled mismatch"

    out_large_bf16 = jax.block_until_ready(improved_model_forward(x_large, params_bf16))
    assert jnp.allclose(out_large_bf16, ref_large, atol=1e-1, rtol=1e-1), "bf16 tiled mismatch"

    print("KERNEL_OK")
</pallas_src>

<mosaic_0001>
module attributes {stable_mosaic.version = 11 : i64} {
  func.func @mlp_kernel(%arg0: memref<8x4xf32, #tpu.memory_space<vmem>>, %arg1: memref<4x128xf32, #tpu.memory_space<vmem>>, %arg2: memref<1x128xf32, #tpu.memory_space<vmem>>, %arg3: memref<128x64xf32, #tpu.memory_space<vmem>>, %arg4: memref<1x64xf32, #tpu.memory_space<vmem>>, %arg5: memref<64x32xf32, #tpu.memory_space<vmem>>, %arg6: memref<1x32xf32, #tpu.memory_space<vmem>>, %arg7: memref<32x2xf32, #tpu.memory_space<vmem>>, %arg8: memref<1x2xf32, #tpu.memory_space<vmem>>, %arg9: memref<8x2xf32, #tpu.memory_space<vmem>>) attributes {dimension_semantics = [], scalar_prefetch = 0 : i64, scratch_operands = 0 : i64, tpu.core_type = #tpu.core_type<tc>} {
    %c0 = arith.constant 0 : index
    %c0_0 = arith.constant 0 : index
    %0 = vector.load %arg1[%c0, %c0_0] : memref<4x128xf32, #tpu.memory_space<vmem>>, vector<4x128xf32>
    %c0_1 = arith.constant 0 : index
    %c0_2 = arith.constant 0 : index
    %1 = vector.load %arg0[%c0_1, %c0_2] : memref<8x4xf32, #tpu.memory_space<vmem>>, vector<8x4xf32>
    %cst = arith.constant dense<0.000000e+00> : vector<8x128xf32>
    %2 = tpu.matmul %1, %0, %cst {dimension_numbers = #tpu.dot_dimension_numbers<[1], [0], [0], [1], [0, 0, 1, 1], [], []>} : vector<8x4xf32>, vector<4x128xf32>, vector<8x128xf32> -> vector<8x128xf32>
    %c0_3 = arith.constant 0 : index
    %c0_4 = arith.constant 0 : index
    %3 = vector.load %arg2[%c0_3, %c0_4] : memref<1x128xf32, #tpu.memory_space<vmem>>, vector<1x128xf32>
    %4 = vector.broadcast %3 : vector<1x128xf32> to vector<8x128xf32>
    %5 = arith.addf %2, %4 : vector<8x128xf32>
    %cst_5 = arith.constant 0.000000e+00 : f32
    %6 = vector.broadcast %cst_5 : f32 to vector<8x128xf32>
    %7 = arith.maximumf %5, %6 : vector<8x128xf32>
    %c0_6 = arith.constant 0 : index
    %c0_7 = arith.constant 0 : index
    %8 = vector.load %arg3[%c0_6, %c0_7] : memref<128x64xf32, #tpu.memory_space<vmem>>, vector<128x64xf32>
    %cst_8 = arith.constant dense<0.000000e+00> : vector<8x64xf32>
    %9 = tpu.matmul %7, %8, %cst_8 {dimension_numbers = #tpu.dot_dimension_numbers<[1], [0], [0], [1], [0, 0, 1, 1], [], []>} : vector<8x128xf32>, vector<128x64xf32>, vector<8x64xf32> -> vector<8x64xf32>
    %c0_9 = arith.constant 0 : index
    %c0_10 = arith.constant 0 : index
    %10 = vector.load %arg4[%c0_9, %c0_10] : memref<1x64xf32, #tpu.memory_space<vmem>>, vector<1x64xf32>
    %11 = vector.broadcast %10 : vector<1x64xf32> to vector<8x64xf32>
    %12 = arith.addf %9, %11 : vector<8x64xf32>
    %cst_11 = arith.constant 0.000000e+00 : f32
    %13 = vector.broadcast %cst_11 : f32 to vector<8x64xf32>
    %14 = arith.maximumf %12, %13 : vector<8x64xf32>
    %c0_12 = arith.constant 0 : index
    %c0_13 = arith.constant 0 : index
    %15 = vector.load %arg5[%c0_12, %c0_13] : memref<64x32xf32, #tpu.memory_space<vmem>>, vector<64x32xf32>
    %cst_14 = arith.constant dense<0.000000e+00> : vector<8x32xf32>
    %16 = tpu.matmul %14, %15, %cst_14 {dimension_numbers = #tpu.dot_dimension_numbers<[1], [0], [0], [1], [0, 0, 1, 1], [], []>} : vector<8x64xf32>, vector<64x32xf32>, vector<8x32xf32> -> vector<8x32xf32>
    %c0_15 = arith.constant 0 : index
    %c0_16 = arith.constant 0 : index
    %17 = vector.load %arg6[%c0_15, %c0_16] : memref<1x32xf32, #tpu.memory_space<vmem>>, vector<1x32xf32>
    %18 = vector.broadcast %17 : vector<1x32xf32> to vector<8x32xf32>
    %19 = arith.addf %16, %18 : vector<8x32xf32>
    %cst_17 = arith.constant 0.000000e+00 : f32
    %20 = vector.broadcast %cst_17 : f32 to vector<8x32xf32>
    %21 = arith.maximumf %19, %20 : vector<8x32xf32>
    %c0_18 = arith.constant 0 : index
    %c0_19 = arith.constant 0 : index
    %22 = vector.load %arg7[%c0_18, %c0_19] : memref<32x2xf32, #tpu.memory_space<vmem>>, vector<32x2xf32>
    %cst_20 = arith.constant dense<0.000000e+00> : vector<8x2xf32>
    %23 = tpu.matmul %21, %22, %cst_20 {dimension_numbers = #tpu.dot_dimension_numbers<[1], [0], [0], [1], [0, 0, 1, 1], [], []>} : vector<8x32xf32>, vector<32x2xf32>, vector<8x2xf32> -> vector<8x2xf32>
    %c0_21 = arith.constant 0 : index
    %c0_22 = arith.constant 0 : index
    %24 = vector.load %arg8[%c0_21, %c0_22] : memref<1x2xf32, #tpu.memory_space<vmem>>, vector<1x2xf32>
    %25 = vector.broadcast %24 : vector<1x2xf32> to vector<8x2xf32>
    %26 = arith.addf %23, %25 : vector<8x2xf32>
    %c0_23 = arith.constant 0 : index
    %c0_24 = arith.constant 0 : index
    %27 = vector.load %arg9[%c0_23, %c0_24] : memref<8x2xf32, #tpu.memory_space<vmem>>, vector<8x2xf32>
    tpu.vector_store %arg9[%c0_23, %c0_24], %26 {strides = array<i32>} : memref<8x2xf32, #tpu.memory_space<vmem>>, vector<8x2xf32>,
    return
  }
}

</mosaic_0001>

<bundles_post_ra>
// kernel: tpu_custom_call.1
= control target key start
LH: loop header
LB: loop body
LE: loop exit
PB: predicated region body
PF: predicated region fallthrough
CT: control target
= control target key end

     0   :  { %vm45_vm0 = vcmask 1043456   ;;  %vm41_vm1 = vcmask 31744   ;;  %v551_v0 = vmov 0.0   ;;  %vm552_vm2 = vmmov 0   ;;  %s732_s1 = inlined_call_operand.vmem [shape: f32[4,128], index: 1, kind: input, shape index: {}]   ;;  %s733_s0 = inlined_call_operand.vmem [shape: f32[8,4], index: 0, kind: input, shape index: {}]   ;;  %s734_s3 = inlined_call_operand.vmem [shape: f32[128,64], index: 3, kind: input, shape index: {}]   ;;  %s735_s5 = inlined_call_operand.vmem [shape: f32[64,32], index: 5, kind: input, shape index: {}]   ;;  %s736_s2 = inlined_call_operand.vmem [shape: f32[1,128], index: 2, kind: input, shape index: {}]   ;;  %s737_s4 = inlined_call_operand.vmem [shape: f32[1,64], index: 4, kind: input, shape index: {}]   ;;  %s738_s7 = inlined_call_operand.vmem [shape: f32[32,2], index: 7, kind: input, shape index: {}]   ;;  %s739_s6 = inlined_call_operand.vmem [shape: f32[1,32], index: 6, kind: input, shape index: {}]   ;;  %s740_s8 = inlined_call_operand.vmem [shape: f32[1,2], index: 8, kind: input, shape index: {}]   ;;  %s741_s9 = inlined_call_operand.vmem [shape: f32[8,2], index: 9, kind: output, shape index: {}]  }
   0x1   :  { %436 = vmatprep.subr.mxu0 %v551_v0  ;;  %v32_v1 = vld [vmem:[%s732_s1] sm:$0xf]  ;;  %438 = vmatprep.mubr.msk.f32.mxu0 %vm552_vm2, %v551_v0  ;;  %v553_v4 = vmov 0.0|0.0   ;;  %v121_v5 = vld [vmem:[%s734_s3 + $0x8] sm:$0xff]  ;;  %v122_v6 = vld [vmem:[%s734_s3 + $0x10] sm:$0xff]  ;;  %vm229_vm3 = vcmask 523264  }
   0x2   :  { %v33_v2 = vld [vmem:[%s733_s0] sm:$0xff]  ;;  %437 = vmatpush3.msk.msra.mxu0 %vm45_vm0, %v32_v1  ;;  %506 = vmatprep.subr.bf16.mxu1 %v553_v4  ;;  %v123_v7 = vld [vmem:[%s734_s3 + $0x18] sm:$0xff]  ;;  %v125_v11 = vld [vmem:[%s734_s3 + $0x28] sm:$0xff]  ;;  %vm315_vm4 = vcmask 261120   ;;  %vm389_vm5 = vcmask 15360  }
   0x3   :  { %v120_v3 = vld [vmem:[%s734_s3] sm:$0xff]  ;;  %439 = vmatmul.mubr.msk.f32.vlgmr.msra.gmra.mrb[0].mxu0 %vm41_vm1, %v33_v2  ;;  %473 = vmatprep.mubr.msk.f32.mxu1 %vm552_vm2, %v551_v0  ;;  %v510_v9 = vpack.c.bf16 %v123_v7, %v122_v6  ;;  %v126_v13 = vld [vmem:[%s734_s3 + $0x30] sm:$0xff]  ;;  %v127_v14 = vld [vmem:[%s734_s3 + $0x38] sm:$0xff] }
   0x4   :  { %v507_v8 = vpack.c.bf16 %v121_v5, %v120_v3  ;;  %530 = vmatprep.subr.bf16.mxu0 %v553_v4  ;;  %492 = vmatprep.mubr.msk.f32.mxu0 %vm552_vm2, %v551_v0  ;;  %v124_v10 = vld [vmem:[%s734_s3 + $0x20] sm:$0xff]  ;;  %v516_v15 = vpack.c.bf16 %v127_v14, %v126_v13  ;;  %v129_v17 = vld [vmem:[%s734_s3 + $0x48] sm:$0xff]  ;;  %v130_v19 = vld [vmem:[%s734_s3 + $0x50] sm:$0xff] }
   0x5   :  { %v513_v12 = vpack.c.bf16 %v125_v11, %v124_v10  ;;  %v128_v16 = vld [vmem:[%s734_s3 + $0x40] sm:$0xff]  ;;  %v131_v20 = vld [vmem:[%s734_s3 + $0x58] sm:$0xff]  ;;  %v133_v23 = vld [vmem:[%s734_s3 + $0x68] sm:$0xff] }
   0x6   :  { %508 = vmatpush3.bf16.msra.mxu1 %v507_v8  ;;  %v519_v18 = vpack.c.bf16 %v129_v17, %v128_v16  ;;  %v522_v21 = vpack.c.bf16 %v131_v20, %v130_v19  ;;  %v132_v22 = vld [vmem:[%s734_s3 + $0x60] sm:$0xff]  ;;  %v134_v25 = vld [vmem:[%s734_s3 + $0x70] sm:$0xff]  ;;  %v135_v26 = vld [vmem:[%s734_s3 + $0x78] sm:$0xff] }
   0x7   :  { %509 = vmatprep.subr.bf16.mxu1 %v553_v4  ;;  %v525_v24 = vpack.c.bf16 %v133_v23, %v132_v22  ;;  %v528_v27 = vpack.c.bf16 %v135_v26, %v134_v25  ;;  %v214_v28 = vld [vmem:[%s735_s5] sm:$0xff]  ;;  %v215_v29 = vld [vmem:[%s735_s5 + $0x8] sm:$0xff]  ;;  %v216_v30 = vld [vmem:[%s735_s5 + $0x10] sm:$0xff] }
   0x8   :  { %v531_v31 = vpack.c.bf16 %v215_v29, %v214_v28  ;;  %v217_v32 = vld [vmem:[%s735_s5 + $0x18] sm:$0xff]  ;;  %v218_v34 = vld [vmem:[%s735_s5 + $0x20] sm:$0xff]  ;;  %v219_v35 = vld [vmem:[%s735_s5 + $0x28] sm:$0xff] }
   0x9   :  { %v534_v33 = vpack.c.bf16 %v217_v32, %v216_v30  ;;  %v537_v36 = vpack.c.bf16 %v219_v35, %v218_v34  ;;  %v395_v37 = vld [vmem:[%s736_s2] ss:$0 sm:$0xff]  ;;  %v220_v42 = vld [vmem:[%s735_s5 + $0x30] sm:$0xff]  ;;  %v221_v43 = vld [vmem:[%s735_s5 + $0x38] sm:$0xff] }
   0xa   :  { %511 = vmatpush3.bf16.msra.mxu1 %v510_v9  ;;  %532 = vmatpush3.bf16.msra.mxu0 %v531_v31  ;;  %v540_v44 = vpack.c.bf16 %v221_v43, %v220_v42  ;;  %v398_v45 = vld [vmem:[%s737_s4] ss:$0 sm:$0xff]  ;;  %v305_v47 = vld [vmem:[%s738_s7 + $0x8] sm:$0xff]  ;;  %v306_v53 = vld [vmem:[%s738_s7 + $0x10] sm:$0xff] }
   0xb   :  { %512 = vmatprep.subr.bf16.mxu1 %v553_v4  ;;  %533 = vmatprep.subr.bf16.mxu0 %v553_v4  ;;  %v304_v46 = vld [vmem:[%s738_s7] sm:$0xff]  ;;  %v307_v54 = vld [vmem:[%s738_s7 + $0x18] sm:$0xff] }
   0xc   :  { %v543_v51 = vpack.c.bf16 %v305_v47, %v304_v46  ;;  %v546_v55 = vpack.c.bf16 %v307_v54, %v306_v53  ;;  %v399_v56 = vld [vmem:[%s739_s6] ss:$0 sm:$0xff] }
   0xd   :  { %v401_v61 = vld [vmem:[%s740_s8] ss:$0 sm:$0xff] }
   0xe   :  { %514 = vmatpush3.bf16.msra.mxu1 %v513_v12  ;;  %535 = vmatpush3.bf16.msra.mxu0 %v534_v33 }
   0xf   :  { %515 = vmatprep.subr.bf16.mxu1 %v553_v4  ;;  %536 = vmatprep.subr.bf16.mxu0 %v553_v4 }
  0x12   :  { %517 = vmatpush3.bf16.msra.mxu1 %v516_v15  ;;  %538 = vmatpush3.bf16.msra.mxu0 %v537_v36 }
  0x13   :  { %518 = vmatprep.subr.bf16.mxu1 %v553_v4  ;;  %539 = vmatprep.subr.bf16.mxu0 %v553_v4 }
  0x16   :  { %520 = vmatpush3.bf16.msra.mxu1 %v519_v18  ;;  %541 = vmatpush3.bf16.msra.mxu0 %v540_v44 }
  0x17   :  { %521 = vmatprep.subr.bf16.mxu1 %v553_v4  ;;  %542 = vmatprep.subr.bf16.mxu0 %v553_v4 }
  0x1a   :  { %523 = vmatpush3.bf16.msra.mxu1 %v522_v21 }
  0x1b   :  { %524 = vmatprep.subr.bf16.mxu1 %v553_v4 }
  0x1e   :  { %526 = vmatpush3.bf16.msra.mxu1 %v525_v24 }
  0x1f   :  { %527 = vmatprep.subr.bf16.mxu1 %v553_v4 }
  0x22   :  { %529 = vmatpush3.bf16.msra.mxu1 %v528_v27 }
  0xd6   :  { %v115_v38 = vpop.f32.mrb[0].mxu0 }
  0xd7   :  { %v116_v39 = vadd.f32 %v395_v37, %v115_v38  ;;  %v440_v40 = vpop.f32.mrb[1].mxu0 }
  0xd9   :  { %v119_v41 = vmax.f32 %v116_v39, 0.0 }
  0xdb   :  { %474 = vmatmul.mubr.f32.vlgmr.msra.gmra.mrb[0].mxu1 %v119_v41 }
 0x1ae   :  { %v209_v48 = vpop.f32.mrb[0].mxu1 }
 0x1af   :  { %v210_v49 = vadd.f32 %v398_v45, %v209_v48  ;;  %v475_v50 = vpop.f32.mrb[1].mxu1 }
 0x1b1   :  { %v213_v52 = vmax.f32 %v210_v49, 0.0 }
 0x1b3   :  { %493 = vmatmul.mubr.msk.f32.vlgmr.msra.gmra.mrb[2].mxu0 %vm229_vm3, %v213_v52 }
 0x1b4   :  { %544 = vmatpush3.bf16.msra.mxu0 %v543_v51  ;;  %503 = vmatprep.mubr.msk.f32.mxu0 %vm552_vm2, %v551_v0 }
 0x1b5   :  { %545 = vmatprep.subr.bf16.mxu0 %v553_v4 }
 0x1b8   :  { %547 = vmatpush3.bf16.msra.mxu0 %v546_v55 }
 0x286   :  { %v299_v57 = vpop.f32.mrb[2].mxu0 }
 0x287   :  { %v300_v58 = vadd.f32 %v399_v56, %v299_v57  ;;  %v494_v59 = vpop.f32.mrb[3].mxu0 }
 0x289   :  { %v303_v60 = vmax.f32 %v300_v58, 0.0 }
 0x28b   :  { %504 = vmatmul.mubr.msk.f32.vlgmr.msra.gmra.mrb[4].mxu0 %vm315_vm4, %v303_v60 }
 0x35e   :  { %v385_v62 = vpop.f32.mrb[4].mxu0 }
 0x35f   :  { %v386_v63 = vadd.f32 %v401_v61, %v385_v62  ;;  %v505_v0 = vpop.f32.mrb[5].mxu0 }
 0x361   :  { %390 = vst.msk [vmem:[%s741_s9] sm:$0xff] %vm389_vm5, %v386_v63 }

</bundles_post_ra>
